<compile_context>
chip_gen: v5e
topology: v5e:2x2
jax: 0.10.0
libtpu: 0.0.40
codegen_flags: <defaults>
</compile_context>

<pallas_src>
import jax
import jax.numpy as jnp
from jax.experimental import pallas as pl
from jax.experimental.pallas import tpu as pltpu


# ----------------------------------------------------------------------------
# Pallas kernel: conv-as-matmul + bias + ps-weight de-bias scale + ReLU.
# One (OC, TILE_HW) lane-dense output tile per grid step.
# ----------------------------------------------------------------------------
def _gossip_module_kernel(ps_ref, w_ref, p_ref, b_ref, o_ref):
    # ps_ref : SMEM (1,) f32      de-bias scale (1/ps_weight when unbiasing, else 1.0)
    # w_ref  : VMEM (OC, Kp) bf16 flattened conv weights, resident (constant index_map)
    # p_ref  : VMEM (Kp, T)  bf16 patches^T tile for this (batch, pixel-tile)
    # b_ref  : VMEM (OC, 1)  f32  bias, resident
    # o_ref  : VMEM (OC, T)  f32  output tile, lanes = pixels (dense stores)
    scale = ps_ref[0]
    # MXU: bf16 x bf16 -> f32 accumulation. Zero-padded K rows contribute nothing.
    acc = jnp.dot(w_ref[...], p_ref[...], preferred_element_type=jnp.float32)
    # Epilogue (VPU): bias, ps-weight de-bias scale, ReLU. f32 throughout.
    o_ref[...] = jnp.maximum(scale * (acc + b_ref[...]), 0.0).astype(o_ref.dtype)


def _conv_relu_pallas(ps_scale, w2d, patches, b2d, tile_hw):
    """ps_scale: [1] f32, w2d: [OC, Kp] bf16, patches: [B, Kp, HWp] bf16,
    b2d: [OC, 1] f32.  Returns [B, OC, HWp] f32."""
    B, Kp, HWp = patches.shape
    OC, _ = w2d.shape
    assert HWp % tile_hw == 0 and tile_hw % 128 == 0
    grid = (B, HWp // tile_hw)

    flops = 2 * OC * Kp * B * HWp
    bytes_accessed = (patches.size * patches.dtype.itemsize
                      + w2d.size * w2d.dtype.itemsize
                      + b2d.size * b2d.dtype.itemsize
                      + B * OC * HWp * 4)

    return pl.pallas_call(
        _gossip_module_kernel,
        out_shape=jax.ShapeDtypeStruct((B, OC, HWp), jnp.float32),
        grid=grid,
        in_specs=[
            # ps de-bias scale: tiny scalar, lives in SMEM.
            pl.BlockSpec(memory_space=pltpu.MemorySpace.SMEM),
            # Weights / bias: constant index_map -> resident in VMEM across the grid.
            pl.BlockSpec((OC, Kp), lambda b, m: (0, 0)),
            # Patches: one (Kp, tile_hw) slab per (batch, pixel-tile) -> pipelined DMA.
            pl.BlockSpec((None, Kp, tile_hw), lambda b, m: (b, 0, m)),
            pl.BlockSpec((OC, 1), lambda b, m: (0, 0)),
        ],
        out_specs=pl.BlockSpec((None, OC, tile_hw), lambda b, m: (b, 0, m)),
        compiler_params=pltpu.CompilerParams(
            dimension_semantics=("parallel", "parallel")),
        cost_estimate=pl.CostEstimate(flops=flops, transcendentals=0,
                                      bytes_accessed=bytes_accessed),
    )(ps_scale, w2d, patches, b2d)


# ----------------------------------------------------------------------------
# Glue (plain JAX): im2col, parameter packing, layout plumbing
# ----------------------------------------------------------------------------
def _round_up(v, m):
    return -(-v // m) * m


def _im2col_nchw(x, kh, kw, pad):
    """NCHW input -> patches [B, K, H*W] with K = C*kh*kw (c-major, tap-minor),
    matching conv_w.reshape(OC, C*kh*kw) row order."""
    B, C, H, W = x.shape
    xp = jnp.pad(x, ((0, 0), (0, 0), (pad, pad), (pad, pad)))
    taps = []
    for i in range(kh):
        for j in range(kw):
            taps.append(xp[:, :, i:i + H, j:j + W])       # [B, C, H, W]
    pat = jnp.stack(taps, axis=2)                          # [B, C, kh*kw, H, W]
    return pat.reshape(B, C * kh * kw, H * W)              # [B, K, HW]


class GossipDataParallelPallas:
    """JAX/Pallas port of GossipDataParallel's forward (single device path)."""

    def __init__(self, conv_w, conv_b, tile_m=512):
        # Wrapped module params: Conv2d weight [OC, C, KH, KW], bias [OC]
        self.conv_w = conv_w
        self.conv_b = conv_b
        self.tile_m = tile_m                 # pixel-tile lane width (multiple of 128)
        first_param_dtype = conv_w.dtype
        # __init__ state of GossipDataParallel (single process, single device)
        self.ps_weight = jnp.ones((1,), dtype=first_param_dtype)
        self.is_ps_numerator = False
        self.lazy_mixing = True              # regular mixing, synch_freq=0, no overlap
        self.gossip_enable = True
        self.gossiping = False
        self.num_updates = 0
        self.synch_freq = 0

    def _forward_pre_hook(self):
        # _query_gossip_queue(): not gossiping -> returns False
        if self.gossip_enable:
            if not self.gossiping:
                pass                          # "not gossiping right now"
            self.num_updates += 1
        # unbias(): divide params by ps_weight only if numerator & not lazy
        if self.is_ps_numerator and not self.lazy_mixing:
            scale = 1.0 / self.ps_weight
        else:
            scale = jnp.ones_like(self.ps_weight)
        self.is_ps_numerator = False
        return scale.astype(jnp.float32)

    def __call__(self, x):
        # layout: x is NCHW [B, C, H, W] (PyTorch-native) on both ends.
        ps_scale = self._forward_pre_hook()
        B, C, H, W = x.shape
        OC, _, KH, KW = self.conv_w.shape
        K = C * KH * KW
        HW = H * W

        # bf16 operands, f32 accumulation/output.
        x_bf = x.astype(jnp.bfloat16)
        w_bf = self.conv_w.astype(jnp.bfloat16)

        # Contraction dim padded only to the bf16 sublane multiple (36 -> 48).
        Kp = _round_up(K, 16)
        # Pixel-tile size: multiple of 128, capped by the (rounded) per-batch HW.
        tile_hw = min(self.tile_m, _round_up(HW, 128))
        HWp = _round_up(HW, tile_hw)

        patches = _im2col_nchw(x_bf, KH, KW, pad=1)                # [B, K, HW]
        if Kp != K or HWp != HW:
            patches = jnp.pad(patches, ((0, 0), (0, Kp - K), (0, HWp - HW)))
        w2d = w_bf.reshape(OC, K)
        if Kp != K:
            w2d = jnp.pad(w2d, ((0, 0), (0, Kp - K)))
        b2d = self.conv_b.reshape(OC, 1).astype(jnp.float32)

        out = _conv_relu_pallas(ps_scale, w2d, patches, b2d, tile_hw)  # [B, OC, HWp]
        if HWp != HW:
            out = out[:, :, :HW]
        # (B, OC, HW) -> (B, OC, H, W) is a pure reshape; no transpose pass needed.
        return out.reshape(B, OC, H, W)


# ----------------------------------------------------------------------------
# Driver
# ----------------------------------------------------------------------------
if __name__ == "__main__":
    key = jax.random.PRNGKey(0)
    k_x, k_w, k_b = jax.random.split(key, 3)

    B, C, H, W = 2, 4, 16, 16
    OC, KH, KW = 8, 3, 3

    x = jax.random.normal(k_x, (B, C, H, W), dtype=jnp.float32)
    conv_w = jax.random.normal(k_w, (OC, C, KH, KW), dtype=jnp.float32) * 0.1
    conv_b = jax.random.normal(k_b, (OC,), dtype=jnp.float32) * 0.1

    # tile_m=128 at this toy size so the pixel grid axis has >1 step
    # (production default is 512 for ~85% of HBM roofline per measured tiling data).
    model = GossipDataParallelPallas(conv_w, conv_b, tile_m=128)
    out = model(x)
    out = jax.block_until_ready(out)

    # Reference: XLA conv (NCHW, pad=1) with the same bf16 operands / f32 acc + ReLU.
    ref = jax.lax.conv_general_dilated(
        x.astype(jnp.bfloat16), conv_w.astype(jnp.bfloat16),
        window_strides=(1, 1), padding=((1, 1), (1, 1)),
        dimension_numbers=("NCHW", "OIHW", "NCHW"),
        preferred_element_type=jnp.float32)
    ref = jnp.maximum(ref + conv_b.reshape(1, OC, 1, 1), 0.0)
    assert out.shape == (B, OC, H, W)
    assert jnp.allclose(out, ref, atol=1e-2, rtol=1e-2)

    print("KERNEL_OK")
</pallas_src>

<mosaic_0001>
module attributes {stable_mosaic.version = 11 : i64} {
  func.func @_gossip_module_kernel(%arg0: i32, %arg1: i32, %arg2: memref<1xf32, #tpu.memory_space<smem>>, %arg3: memref<8x48xbf16, #tpu.memory_space<vmem>>, %arg4: memref<1x48x128xbf16, #tpu.memory_space<vmem>>, %arg5: memref<8x1xf32, #tpu.memory_space<vmem>>, %arg6: memref<1x8x128xf32, #tpu.memory_space<vmem>>) attributes {dimension_semantics = [#tpu.dimension_semantics<parallel>, #tpu.dimension_semantics<parallel>], iteration_bounds = array<i64: 2, 2>, scalar_prefetch = 0 : i64, scratch_operands = 0 : i64, tpu.core_type = #tpu.core_type<tc>, window_params = [{transform_indices = @transform_0, window_bounds = array<i64: 1>}, {pipeline_mode = #tpu.pipeline_mode<synchronous>, transform_indices = @transform_1, window_bounds = array<i64: 8, 48>}, {transform_indices = @transform_2, window_bounds = array<i64: 1, 48, 128>}, {pipeline_mode = #tpu.pipeline_mode<synchronous>, transform_indices = @transform_3, window_bounds = array<i64: 8, 1>}, {transform_indices = @transform_4, window_bounds = array<i64: 1, 8, 128>}]} {
    %c0 = arith.constant 0 : index
    %0 = memref.load %arg2[%c0] : memref<1xf32, #tpu.memory_space<smem>>
    %c0_0 = arith.constant 0 : index
    %c0_1 = arith.constant 0 : index
    %1 = vector.load %arg3[%c0_0, %c0_1] : memref<8x48xbf16, #tpu.memory_space<vmem>>, vector<8x48xbf16>
    %c0_2 = arith.constant 0 : index
    %c0_3 = arith.constant 0 : index
    %c0_4 = arith.constant 0 : index
    %2 = vector.load %arg4[%c0_2, %c0_3, %c0_4] : memref<1x48x128xbf16, #tpu.memory_space<vmem>>, vector<1x48x128xbf16>
    %3 = vector.shape_cast %2 : vector<1x48x128xbf16> to vector<48x128xbf16>
    %cst = arith.constant dense<0.000000e+00> : vector<8x128xf32>
    %4 = tpu.matmul %1, %3, %cst {dimension_numbers = #tpu.dot_dimension_numbers<[1], [0], [0], [1], [0, 0, 1, 1], [], []>} : vector<8x48xbf16>, vector<48x128xbf16>, vector<8x128xf32> -> vector<8x128xf32>
    %c0_5 = arith.constant 0 : index
    %c0_6 = arith.constant 0 : index
    %5 = vector.load %arg5[%c0_5, %c0_6] : memref<8x1xf32, #tpu.memory_space<vmem>>, vector<8x1xf32>
    %6 = vector.broadcast %5 : vector<8x1xf32> to vector<8x128xf32>
    %7 = arith.addf %4, %6 : vector<8x128xf32>
    %8 = vector.broadcast %0 : f32 to vector<8x128xf32>
    %9 = arith.mulf %8, %7 : vector<8x128xf32>
    %cst_7 = arith.constant 0.000000e+00 : f32
    %10 = vector.broadcast %cst_7 : f32 to vector<8x128xf32>
    %11 = arith.maximumf %9, %10 : vector<8x128xf32>
    %c0_8 = arith.constant 0 : index
    %c0_9 = arith.constant 0 : index
    %c0_10 = arith.constant 0 : index
    %12 = vector.load %arg6[%c0_8, %c0_9, %c0_10] : memref<1x8x128xf32, #tpu.memory_space<vmem>>, vector<1x8x128xf32>
    %13 = vector.shape_cast %12 : vector<1x8x128xf32> to vector<8x128xf32>
    %14 = vector.shape_cast %11 : vector<8x128xf32> to vector<1x8x128xf32>
    tpu.vector_store %arg6[%c0_8, %c0_9, %c0_10], %14 {strides = array<i32>} : memref<1x8x128xf32, #tpu.memory_space<vmem>>, vector<1x8x128xf32>,
    return
  }
  func.func @transform_0(%arg0: i32, %arg1: i32) -> i32 {
    %c0_i32 = arith.constant 0 : i32
    %c0_i32_0 = arith.constant 0 : i32
    return %c0_i32 : i32
  }
  func.func @transform_1(%arg0: i32, %arg1: i32) -> (i32, i32) {
    %c0_i32 = arith.constant 0 : i32
    %c0_i32_0 = arith.constant 0 : i32
    %c0_i32_1 = arith.constant 0 : i32
    return %c0_i32, %c0_i32_0 : i32, i32
  }
  func.func @transform_2(%arg0: i32, %arg1: i32) -> (i32, i32, i32) {
    %c0_i32 = arith.constant 0 : i32
    %c0_i32_0 = arith.constant 0 : i32
    return %arg0, %c0_i32, %arg1 : i32, i32, i32
  }
  func.func @transform_3(%arg0: i32, %arg1: i32) -> (i32, i32) {
    %c0_i32 = arith.constant 0 : i32
    %c0_i32_0 = arith.constant 0 : i32
    %c0_i32_1 = arith.constant 0 : i32
    return %c0_i32, %c0_i32_0 : i32, i32
  }
  func.func @transform_4(%arg0: i32, %arg1: i32) -> (i32, i32, i32) {
    %c0_i32 = arith.constant 0 : i32
    %c0_i32_0 = arith.constant 0 : i32
    return %arg0, %c0_i32, %arg1 : i32, i32, i32
  }
}

</mosaic_0001>

<bundles_post_ra>
// kernel: tpu_custom_call.1
= control target key start
LH: loop header
LB: loop body
LE: loop exit
PB: predicated region body
PF: predicated region fallthrough
CT: control target
= control target key end

     0   :  { %s818_s0 = inlined_call_operand.<no memory space> [shape: f32[1], index: 0, kind: input, shape index: {}]   ;;  %s819_s1 = inlined_call_operand.vmem [shape: bf16[8,48], index: 1, kind: input, shape index: {}]   ;;  %s820_s2 = inlined_call_operand.hbm [shape: bf16[2,48,256], index: 2, kind: input, shape index: {}]   ;;  %s821_s3 = inlined_call_operand.vmem [shape: f32[8,1], index: 3, kind: input, shape index: {}]   ;;  %s822_s4 = inlined_call_operand.hbm [shape: f32[2,8,256], index: 4, kind: output, shape index: {}]  }
   0x1   :  { %9 = sst [smem:[#allocation2]] %s818_s0 }
   0x2   :  { %10 = vsyncpa [#allocation4], 0 }
   0x3   :  { %12 = vsyncpa [#allocation4 + $0x1], 0 }
   0x4   :  { %13 = vsyncpa [#allocation5], 0 }
   0x5   :  { %15 = vsyncpa [#allocation5 + $0x1], 0  ;;  %s669_s17 = smov 0   ;;  %s671_s18 = smov 0  }
   0x6   :  { %s673_s19 = smov 0   ;;  %s675_s20 = smov 0  }
   0x7   :  { %s677_s21 = smov 0   ;;  %s679_s22 = smov 0  }
   0x8   :  { %s681_s23 = smov 0   ;;  %s683_s24 = smov 0  }
   0x9 LB: > { %s393_s0 = sadd.s32 4294967295, %s635_s24   ;;  %s394_s25 = sadd.s32 4294967294, %s635_s24   ;;  %s635_s24 = sphi %s683_s24, %s21_s24   ;;  %s631_s23 = sphi %s681_s23, %s841_s23   ;;  %s627_s22 = sphi %s679_s22, %s840_s22   ;;  %s623_s21 = sphi %s677_s21, %s839_s21   ;;  %s619_s20 = sphi %s675_s20, %s838_s20   ;;  %s615_s19 = sphi %s673_s19, %s837_s19   ;;  %s611_s18 = sphi %s671_s18, %s836_s18   ;;  %s607_s17 = sphi %s669_s17, %s835_s17  }
   0xa   : > { %s30_s26 = sadd.s32 1, %s627_s22  ;;  %s33_s27 = sadd.s32 1, %s631_s23 }
   0xb   : > { %p31_p0 = scmp.ge.s32.totalorder %s30_s26, 2  ;;  %s84_s28 = sadd.s32 1, %s615_s19 }
   0xc   : > { %p91_p1 = scmp.ne.s32.totalorder %s615_s19, %s611_s18  ;;  %p92_p2 = scmp.eq.s32.totalorder %s635_s24, 0 }
   0xd   : > { %s843_s26 = smov (%p31_p0, %s30_s26), 0  ;;  %s845_s27 = smov (!%p31_p0, %s33_s27), %s631_s23 }
   0xe   : > { %825 = sst [smem:[#allocation9_spill]] %s843_s26  ;;  %s80_s29 = ssub.s32 %s627_s22, %s843_s26 }
   0xf   : > { %p722_p3 = por %p92_p2, %p91_p1  ;;  %p35_p4 = scmp.ge.s32.totalorder %s845_s27, 2 }
  0x10   : > { %p97_p5 = scmp.ne.s32.totalorder %s611_s18, %s607_s17  ;;  %p98_p6 = scmp.eq.s32.totalorder %s393_s0, 0 }
  0x11   : > { %p144_p7 = scmp.eq.s32.totalorder %s393_s0, 3  ;;  %s847_s27 = smov (%p35_p4, %s845_s27), 0 }
  0x12   : > { %827 = sst [smem:[#allocation10_spill]] %s847_s27  ;;  %p730_p8 = por %p98_p6, %p97_p5 }
  0x13   : > { %p734_p9 = por %p144_p7, %p91_p1  ;;  %s79_s7 = ssub.s32 %s631_s23, %s847_s27 }
  0x14   : > { %p150_p10 = scmp.eq.s32.totalorder %s394_s25, 3  ;;  %s81_s8 = sor.u32 %s80_s29, %s79_s7 }
  0x15   : > { %p82_p11 = scmp.eq.s32.totalorder %s81_s8, 0  ;;  %p436_p13 = scmp.lt.s32.totalorder %s635_s24, 4 }
  0x16   : > { %p740_p12 = por %p150_p10, %p97_p5  ;;  %s179_s10 = sand.u32 1, %s615_s19  }
  0x17   : > { %s747_s11 = scalar_select %p82_p11, %s615_s19, %s84_s28  }
  0x18   : > { %s421_s12 = smul.u32 24, %s179_s10  ;;  %p429_p0 = pnand %p436_p13, %p722_p3 }
  0x19   : > { %831 = sst [smem:[#allocation11_spill]] %s747_s11  ;;  %s422_s13 = smul.u32 12, %s631_s23 }
  0x1a   : > { %s183_s15 = scalar_lea.vmem [#allocation3], %s421_s12  ;;  %s180_s27 = scalar_lea.sflag [#allocation4], %s179_s10 }
  0x1b   : > { %s187_s14 = sadd.s32 %s627_s22, %s422_s13  ;;  %s192_s16 = sshll.u32 %s183_s15, 4  ;;  %s193_s16 = int_to_ptr.vmem [resolvable:$true] %s192_s16 }
  0x1c   : > { %s397_s0 = sshll.u32 %s187_s14, 2  ;;  %s637_s28 = smov 128  }
  0x1d   : > { %s189_s7 = scalar_lea.hbm %s820_s2, %s397_s0  ;;  %s638_s26 = smov 64  }
  0x1e   : > { %s190_s8 = sshll.u32 %s189_s7, 4  ;;  %s639_s11 = smov 4   ;;  %s191_s8 = int_to_ptr.hbm [resolvable:$true] %s190_s8 }
  0x1f   : > { %431 = dma.hbm_to_vmem [thread:$0]  (!%p429_p0), %s191_s8, 384, %s193_s16, %s180_s27, %s637_s28, %s638_s26, %s639_s11  }
  0x20   : > { %p398_p1 = scmp.ge.s32.totalorder %s635_s24, 1  ;;  %p200_p2 = scmp.lt.s32.totalorder %s635_s24, 5 }
  0x22   : > { %p201_p4 = pnand %p398_p1, %p200_p2 }
  0x23   : > { %s759_s30 = sand.u32 (!%p201_p4), 1, %s611_s18  }
  0x24   : > { %204 = sbr.rel (%p201_p4) target bundleno = 190 (0xbe), region = 36  ;;  %s207_s13 = scalar_lea.sflag (!%p201_p4), [#allocation4], %s759_s30 }
  0x25   : > { %s423_s12 = smul.u32 (!%p201_p4), 24, %s759_s30 }
  0x27   : > { %s210_s14 = scalar_lea.vmem (!%p201_p4), [#allocation3], %s423_s12 }
  0x29   : > { %598 = dma.done.wait (%p730_p8), %s207_s13, 384  }
  0x2a   : > { %600 = vsyncadd (%p730_p8), %s207_s13, 4294966912  ;;  %v640_v0 = vmov 0   ;;  %v420_v1 = vld [vmem:[%s210_s14 + $0x10] sm:$0xff]  ;;  %v245_v2 = vld [vmem:[%s821_s3] sm:$0xff]  ;;  %vm269_vm0 = vcmask 392192   ;;  %s414_s5 = sshll.u32 %s623_s21, 1 }
  0x2b   : > { %506 = vset.pattern.permute.xlu0 %v640_v0  ;;  %278 = vmatpush.bf16.msra.mxu0 %v420_v1  ;;  %v419_v3 = vld [vmem:[%s210_s14 + $0x8] sm:$0xff]  ;;  %v418_v4 = vld [vmem:[%s210_s14] sm:$0xff]  ;;  %s237_s15 = sld [smem:[#allocation2]]  ;;  %s301_s16 = sadd.s32 %s619_s20, %s414_s5 }
  0x2c   : > { %248 = vperm.xlu0 %506, %v245_v2   ;;  %v238_v5 = vld [vmem:[%s819_s1] sm:$0xf]  ;;  %s399_s0 = sshll.u32 %s759_s30, 3  ;;  %s415_s25 = sshll.u32 %s301_s16, 3 }
  0x2d   : > { %s303_s8 = scalar_lea.hbm %s822_s4, %s415_s25  ;;  %s235_s28 = scalar_lea.vmem [#allocation6], %s399_s0 }
  0x2e   : > { %s305_s12 = sshll.u32 %s235_s28, 4  ;;  %s307_s13 = sshll.u32 %s303_s8, 4  ;;  %s306_s12 = int_to_ptr.vmem [resolvable:$true] %s305_s12  ;;  %s308_s13 = int_to_ptr.hbm [resolvable:$true] %s307_s13 }
  0x2f   : > { %279 = vmatpush.bf16.msra.mxu0 %v419_v3  ;;  %s291_s20 = scalar_lea.sflag [#allocation5], %s759_s30  ;;  %s551_s21 = sshra.s32 %s308_s13, 4  ;;  %s552_s21 = int_to_ptr.hbm [resolvable:$true] %s551_s21 }
  0x30   : > { %s553_s14 = scalar_lea.hbm %s552_s21, 8  ;;  %s557_s10 = scalar_lea.hbm %s822_s4, 32 }
  0x31   : > { %v286_v8 = vstv %s237_s15  ;;  %p554_p3 = scmp.ne.s32.totalorder %s552_s21, %s553_s14  ;;  %p558_p7 = scmp.lt.s32.totalorder %s552_s21, %s822_s4 }
  0x32   : > { %p559_p8 = scmp.lt.s32.totalorder %s557_s10, %s553_s14 }
  0x33   : > { %280 = vmatpush.bf16.msra.mxu0 %v418_v4  ;;  %p555_p5 = pnand %p554_p3, %p734_p9 }
  0x34   : > { %p560_p10 = por %p559_p8, %p558_p7 }
  0x35   : > { %p556_p6 = pneg %p555_p5 }
  0x36   : > { %412 = vmatmul.msk.bf16.vlgmr.msra.gmra.mxu0 %vm269_vm0, %v238_v5 }
  0x37   : > { %p561_p11 = pnand %p560_p10, %p556_p6 }
  0x9e   : > { %v249_v6 = vpop.permute.xlu0 %248 }
  0xb3   : > { %v282_v7 = vpop.f32.mrf.mxu0 }
  0xb4   : > { %v283_v9 = vadd.f32 %v282_v7, %v249_v6 }
  0xb6   : > { %v287_v10 = vmul.f32 %v286_v8, %v283_v9 }
  0xb8   : > { %v288_v11 = vmax.f32 %v287_v10, 0.0 }
  0xba   : > { %289 = vst [vmem:[%s235_s28] sm:$0xff] %v288_v11 }
  0xbb   : > { %v284_v12 = vpop.f32.mrf.mxu0 }
  0xbc   : > { %564 = shalt.err (!%p561_p11)
}
  0xbd   : > { %426 = dma.vmem_to_hbm [thread:$0]  (%p734_p9), %s306_s12, 128, %s308_s13, %s291_s20  }
  0xbe PF: > { %p437_p13 = scmp.ge.s32.totalorder %s635_s24, 2  ;;  %s319_s30 = sand.u32 1, %s607_s17  }
  0xbf   : > { %s320_s15 = scalar_lea.sflag [#allocation5], %s319_s30 }
  0xc0   : > { %p433_p0 = pnand %p437_p13, %p740_p12 }
  0xc2   : > { %p434_p1 = pneg %p433_p0 }
  0xc4   : > { %602 = dma.done.wait (%p434_p1), %s320_s15, 128  }
  0xc5   : > { %604 = vsyncadd (%p434_p1), %s320_s15, 4294967168  ;;  %s21_s24 = sadd.s32 1, %s635_s24   ;;  %s832_s16 = sld [smem:[#allocation11_spill]] }
  0xc6   : > { %p18_p2 = scmp.ge.s32.totalorder %s21_s24, 6   ;;  %s833_s6 = sld [smem:[#allocation9_spill]] }
  0xc7   : > { %s834_s0 = sld [smem:[#allocation10_spill]]  ;;  %s835_s17 = smov %s611_s18 }
  0xc8   : > { %s836_s18 = smov %s615_s19  ;;  %s838_s20 = smov %s627_s22 }
  0xc9   : > { %s839_s21 = smov %s631_s23  ;;  %20 = sbr.rel (!%p18_p2) target bundleno = 9 (0x9), region = 81 }
  0xcb   : > { %s837_s19 = smov %s832_s16 }
  0xcc   : > { %s840_s22 = smov %s833_s6 }
  0xcd   : > { %s841_s23 = smov %s834_s0 }
  0xce   :  { %326 = vsyncpa [#allocation4], 1 }
  0xcf   :  { %328 = vsyncpa [#allocation4 + $0x1], 1 }
  0xd0   :  { %329 = vsyncpa [#allocation5], 1 }
  0xd1   :  { %331 = vsyncpa [#allocation5 + $0x1], 1 }

</bundles_post_ra>
